<compile_context>
chip_gen: v7x
topology: tpu7x:2x2x1
jax: 0.10.0
libtpu: 0.0.40
codegen_flags: <defaults>
</compile_context>

<pallas_src>
import jax
import jax.numpy as jnp
from jax.experimental import pallas as pl
from jax.experimental.pallas import tpu as pltpu

NUM_CLASSES = 10
HIDDEN = 50
LANE = 128                       # TPU lane width: pad hidden dim to this
SUBLANE = 8                      # batch-tile rows must be a multiple of this
DEFAULT_BLOCK_B = 2048           # big tiles amortize per-grid-step overhead
VMEM_BUDGET = 40 * 1024 * 1024   # conservative: fits v7x 64 MiB physical VMEM


def _round_up(n, m):
    return ((n + m - 1) // m) * m


def mlp_kernel(x_ref, w1_ref, b1_ref, w2_ref, b2_ref, o_ref):
    # bf16 MXU operands (native path on v6e/v7x), f32 accumulation.  Cast is
    # done in VMEM, so it adds no HBM traffic; it is a no-op for bf16 inputs.
    xb = x_ref[...].astype(jnp.bfloat16)
    h = jnp.dot(xb, w1_ref[...], preferred_element_type=jnp.float32)
    # Bias + ReLU in f32 (v5e VPU has no bf16).  Padded hidden columns stay
    # exactly zero (zero weight columns + zero bias -> relu(0) = 0).
    h = jnp.maximum(h + b1_ref[...], 0.0)
    y = jnp.dot(h.astype(jnp.bfloat16), w2_ref[...],
                preferred_element_type=jnp.float32)
    # Store only the real `num_classes` columns: the out block is (TB, C), so
    # the HBM write is ~12.8x smaller than a 128-lane padded f32 slab.
    c = o_ref.shape[-1]
    o_ref[...] = (y[:, :c] + b2_ref[...]).astype(o_ref.dtype)


def prepare_params(w1, b1, w2, b2):
    """One-time weight prep, hoisted out of the per-call path.

    Transposes to (in_features, out_features) so the MXU consumes the weights
    directly, zero-pads the hidden dim to the 128-lane width, casts matmul
    operands to bf16, and keeps biases in f32 for the VPU adds.
    """
    H, D = w1.shape
    C = w2.shape[0]
    Hp = _round_up(H, LANE)   # 50 -> 128
    Cp = _round_up(C, LANE)   # 10 -> 128 (extra columns are sliced off in-kernel)
    w1_t = jnp.zeros((D, Hp), jnp.bfloat16).at[:, :H].set(w1.T.astype(jnp.bfloat16))
    b1_p = jnp.zeros((1, Hp), jnp.float32).at[:, :H].set(b1.astype(jnp.float32))
    w2_t = jnp.zeros((Hp, Cp), jnp.bfloat16).at[:H, :C].set(w2.T.astype(jnp.bfloat16))
    b2_p = b2.astype(jnp.float32).reshape(1, C)
    return w1_t, b1_p, w2_t, b2_p


def _vmem_bytes(tb, d, c, x_itemsize):
    xb = 2 * tb * d * x_itemsize                                   # x, double-buffered
    outb = 2 * tb * c * 4                                          # f32 out, double-buffered
    wts = 2 * (d * LANE * 2 + LANE * LANE * 2 + LANE * 4 + c * 4)  # resident weights/biases
    hid = tb * LANE * (4 + 2)                                      # f32 hidden + bf16 recast
    return xb + outb + wts + hid


def nn_forward(x, w1_t, b1_p, w2_t, b2_p, *, block_b=DEFAULT_BLOCK_B):
    """x: (B, D) f32 or bf16; remaining args come from prepare_params()."""
    B, D = x.shape
    Hp = w1_t.shape[1]
    Cp = w2_t.shape[1]
    C = b2_p.shape[1]

    # Only pad when the batch is smaller than one sublane; otherwise rely on
    # partial last blocks on the batch dim (out-of-range rows are masked on
    # writeback), avoiding a full jnp.pad copy of x in HBM.
    B_eff = B
    if B < SUBLANE:
        x = jnp.pad(x, ((0, SUBLANE - B), (0, 0)))
        B_eff = SUBLANE

    # Batch tile: multiple of 8, >=2 grid steps when the batch allows (v7x has
    # two TensorCores), capped by block_b and by the VMEM budget.
    tb = min(block_b, max(pl.cdiv(B_eff, 2), SUBLANE))
    tb = _round_up(tb, SUBLANE)
    while _vmem_bytes(tb, D, C, x.dtype.itemsize) > VMEM_BUDGET and tb > SUBLANE:
        tb = max(SUBLANE, _round_up(tb // 2, SUBLANE))

    vmem_limit = int(min(64 << 20,
                         max(16 << 20,
                             _vmem_bytes(tb, D, C, x.dtype.itemsize) * 3 // 2 + (2 << 20))))

    out = pl.pallas_call(
        mlp_kernel,
        out_shape=jax.ShapeDtypeStruct((B_eff, C), jnp.float32),
        grid=(pl.cdiv(B_eff, tb),),
        in_specs=[
            pl.BlockSpec((tb, D), lambda i: (i, 0)),    # x streams per batch tile
            pl.BlockSpec((D, Hp), lambda i: (0, 0)),    # weights/biases VMEM-resident
            pl.BlockSpec((1, Hp), lambda i: (0, 0)),
            pl.BlockSpec((Hp, Cp), lambda i: (0, 0)),
            pl.BlockSpec((1, C), lambda i: (0, 0)),
        ],
        out_specs=pl.BlockSpec((tb, C), lambda i: (i, 0)),
        compiler_params=pltpu.CompilerParams(
            dimension_semantics=("parallel",),
            vmem_limit_bytes=vmem_limit),
    )(x, w1_t, b1_p, w2_t, b2_p)

    return out if B_eff == B else out[:B]


def init_params(key, input_size, num_classes):
    """Deterministic init mimicking PyTorch's default Linear init
    (uniform in +-1/sqrt(fan_in))."""
    k1, k2, k3, k4 = jax.random.split(key, 4)
    bound1 = 1.0 / jnp.sqrt(input_size)
    bound2 = 1.0 / jnp.sqrt(HIDDEN)
    w1 = jax.random.uniform(k1, (HIDDEN, input_size), jnp.float32, -bound1, bound1)
    b1 = jax.random.uniform(k2, (HIDDEN,), jnp.float32, -bound1, bound1)
    w2 = jax.random.uniform(k3, (num_classes, HIDDEN), jnp.float32, -bound2, bound2)
    b2 = jax.random.uniform(k4, (num_classes,), jnp.float32, -bound2, bound2)
    return w1, b1, w2, b2


if __name__ == "__main__":
    key = jax.random.PRNGKey(0)
    k_x, k_p = jax.random.split(key)

    batch = 8
    input_size = 32

    x = jax.random.normal(k_x, (batch, input_size), jnp.float32)
    w1, b1, w2, b2 = init_params(k_p, input_size, NUM_CLASSES)

    # One-time weight prep (transpose / pad / bf16 cast), hoisted out of the call.
    params = prepare_params(w1, b1, w2, b2)

    out = nn_forward(x, *params)
    out = jax.block_until_ready(out)

    # Pure-JAX f32 reference; tolerance loosened for bf16 MXU operands.
    ref = jnp.maximum(x @ w1.T + b1, 0.0) @ w2.T + b2
    assert out.shape == (batch, NUM_CLASSES)
    assert jnp.allclose(out, ref, atol=3e-2, rtol=3e-2), \
        float(jnp.max(jnp.abs(out - ref)))

    print("KERNEL_OK")
</pallas_src>

<mosaic_0001>
module attributes {stable_mosaic.version = 11 : i64} {
  func.func @mlp_kernel(%arg0: i32, %arg1: memref<8x32xf32, #tpu.memory_space<vmem>>, %arg2: memref<32x128xbf16, #tpu.memory_space<vmem>>, %arg3: memref<1x128xf32, #tpu.memory_space<vmem>>, %arg4: memref<128x128xbf16, #tpu.memory_space<vmem>>, %arg5: memref<1x10xf32, #tpu.memory_space<vmem>>, %arg6: memref<8x10xf32, #tpu.memory_space<vmem>>) attributes {dimension_semantics = [#tpu.dimension_semantics<parallel>], iteration_bounds = array<i64: 1>, scalar_prefetch = 0 : i64, scratch_operands = 0 : i64, tpu.core_type = #tpu.core_type<tc>, window_params = [{transform_indices = @transform_0, window_bounds = array<i64: 8, 32>}, {pipeline_mode = #tpu.pipeline_mode<synchronous>, transform_indices = @transform_1, window_bounds = array<i64: 32, 128>}, {pipeline_mode = #tpu.pipeline_mode<synchronous>, transform_indices = @transform_2, window_bounds = array<i64: 1, 128>}, {pipeline_mode = #tpu.pipeline_mode<synchronous>, transform_indices = @transform_3, window_bounds = array<i64: 128, 128>}, {pipeline_mode = #tpu.pipeline_mode<synchronous>, transform_indices = @transform_4, window_bounds = array<i64: 1, 10>}, {transform_indices = @transform_5, window_bounds = array<i64: 8, 10>}]} {
    %c0 = arith.constant 0 : index
    %c0_0 = arith.constant 0 : index
    %0 = vector.load %arg1[%c0, %c0_0] : memref<8x32xf32, #tpu.memory_space<vmem>>, vector<8x32xf32>
    %1 = arith.truncf %0 : vector<8x32xf32> to vector<8x32xbf16>
    %c0_1 = arith.constant 0 : index
    %c0_2 = arith.constant 0 : index
    %2 = vector.load %arg2[%c0_1, %c0_2] : memref<32x128xbf16, #tpu.memory_space<vmem>>, vector<32x128xbf16>
    %cst = arith.constant dense<0.000000e+00> : vector<8x128xf32>
    %3 = tpu.matmul %1, %2, %cst {dimension_numbers = #tpu.dot_dimension_numbers<[1], [0], [0], [1], [0, 0, 1, 1], [], []>} : vector<8x32xbf16>, vector<32x128xbf16>, vector<8x128xf32> -> vector<8x128xf32>
    %c0_3 = arith.constant 0 : index
    %c0_4 = arith.constant 0 : index
    %4 = vector.load %arg3[%c0_3, %c0_4] : memref<1x128xf32, #tpu.memory_space<vmem>>, vector<1x128xf32>
    %5 = vector.broadcast %4 : vector<1x128xf32> to vector<8x128xf32>
    %6 = arith.addf %3, %5 : vector<8x128xf32>
    %cst_5 = arith.constant 0.000000e+00 : f32
    %7 = vector.broadcast %cst_5 : f32 to vector<8x128xf32>
    %8 = arith.maximumf %6, %7 : vector<8x128xf32>
    %9 = arith.truncf %8 : vector<8x128xf32> to vector<8x128xbf16>
    %c0_6 = arith.constant 0 : index
    %c0_7 = arith.constant 0 : index
    %10 = vector.load %arg4[%c0_6, %c0_7] : memref<128x128xbf16, #tpu.memory_space<vmem>>, vector<128x128xbf16>
    %cst_8 = arith.constant dense<0.000000e+00> : vector<8x128xf32>
    %11 = tpu.matmul %9, %10, %cst_8 {dimension_numbers = #tpu.dot_dimension_numbers<[1], [0], [0], [1], [0, 0, 1, 1], [], []>} : vector<8x128xbf16>, vector<128x128xbf16>, vector<8x128xf32> -> vector<8x128xf32>
    %12 = vector.extract_strided_slice %11 {offsets = [0, 0], sizes = [8, 10], strides = [1, 1]} : vector<8x128xf32> to vector<8x10xf32>
    %c0_9 = arith.constant 0 : index
    %c0_10 = arith.constant 0 : index
    %13 = vector.load %arg5[%c0_9, %c0_10] : memref<1x10xf32, #tpu.memory_space<vmem>>, vector<1x10xf32>
    %14 = vector.broadcast %13 : vector<1x10xf32> to vector<8x10xf32>
    %15 = arith.addf %12, %14 : vector<8x10xf32>
    %c0_11 = arith.constant 0 : index
    %c0_12 = arith.constant 0 : index
    %16 = vector.load %arg6[%c0_11, %c0_12] : memref<8x10xf32, #tpu.memory_space<vmem>>, vector<8x10xf32>
    tpu.vector_store %arg6[%c0_11, %c0_12], %15 {strides = array<i32>} : memref<8x10xf32, #tpu.memory_space<vmem>>, vector<8x10xf32>,
    return
  }
  func.func @transform_0(%arg0: i32) -> (i32, i32) {
    %c0_i32 = arith.constant 0 : i32
    %c0_i32_0 = arith.constant 0 : i32
    return %arg0, %c0_i32 : i32, i32
  }
  func.func @transform_1(%arg0: i32) -> (i32, i32) {
    %c0_i32 = arith.constant 0 : i32
    %c0_i32_0 = arith.constant 0 : i32
    %c0_i32_1 = arith.constant 0 : i32
    return %c0_i32, %c0_i32_0 : i32, i32
  }
  func.func @transform_2(%arg0: i32) -> (i32, i32) {
    %c0_i32 = arith.constant 0 : i32
    %c0_i32_0 = arith.constant 0 : i32
    %c0_i32_1 = arith.constant 0 : i32
    return %c0_i32, %c0_i32_0 : i32, i32
  }
  func.func @transform_3(%arg0: i32) -> (i32, i32) {
    %c0_i32 = arith.constant 0 : i32
    %c0_i32_0 = arith.constant 0 : i32
    %c0_i32_1 = arith.constant 0 : i32
    return %c0_i32, %c0_i32_0 : i32, i32
  }
  func.func @transform_4(%arg0: i32) -> (i32, i32) {
    %c0_i32 = arith.constant 0 : i32
    %c0_i32_0 = arith.constant 0 : i32
    %c0_i32_1 = arith.constant 0 : i32
    return %c0_i32, %c0_i32_0 : i32, i32
  }
  func.func @transform_5(%arg0: i32) -> (i32, i32) {
    %c0_i32 = arith.constant 0 : i32
    %c0_i32_0 = arith.constant 0 : i32
    return %arg0, %c0_i32 : i32, i32
  }
}

</mosaic_0001>

<bundles_post_ra>
// kernel: tpu_custom_call.1
= control target key start
LH: loop header
LB: loop body
LE: loop exit
PB: predicated region body
PF: predicated region fallthrough
CT: control target
= control target key end

     0   :  { %10 = vsyncpa [#allocation3], 0  ;;  %s525_s0 = inlined_call_operand.hbm [shape: f32[8,32], index: 0, kind: input, shape index: {}]   ;;  %s526_s1 = inlined_call_operand.hbm [shape: bf16[32,128], index: 1, kind: input, shape index: {}]   ;;  %s527_s2 = inlined_call_operand.vmem [shape: f32[1,128], index: 2, kind: input, shape index: {}]   ;;  %s528_s3 = inlined_call_operand.hbm [shape: bf16[128,128], index: 3, kind: input, shape index: {}]   ;;  %s529_s4 = inlined_call_operand.vmem [shape: f32[1,10], index: 4, kind: input, shape index: {}]   ;;  %s530_s5 = inlined_call_operand.hbm [shape: f32[8,10], index: 5, kind: output, shape index: {}]  }
   0x1   :  { %11 = vsyncpa [#allocation6], 0 }
   0x2   :  { %12 = vsyncpa [#allocation4], 0  ;;  %s427_s18 = smov [#allocation5]   ;;  %s333_s22 = scalar_lea.hbm %s526_s1, 256 }
   0x3   :  { %s28_s19 = sshll.u32 %s427_s18, 4  ;;  %p334_p0 = scmp.ne.s32.totalorder %s526_s1, %s333_s22  ;;  %s29_s19 = int_to_ptr.vmem [resolvable:$true] %s28_s19 }
   0x4   :  { %p337_p1 = scmp.lt.u32.totalorder %s333_s22, %s526_s1 }
   0x6   :  { %p339_p2 = pnand %p337_p1, %p334_p0 }
   0x8   :  { %342 = shalt.err (!%p339_p2)
}
   0x9   :  { %s343_s27 = scalar_lea.vmem %s29_s19, 256  ;;  %p348_p4 = scmp.lt.s32.totalorder %s29_s19, %s29_s19 }
   0xa   :  { %p344_p3 = scmp.ne.s32.totalorder %s29_s19, %s343_s27  ;;  %p349_p5 = scmp.lt.s32.totalorder %s343_s27, %s343_s27 }
   0xc   :  { %p350_p6 = por %p349_p5, %p348_p4 }
   0xe   :  { %p351_p7 = pnand %p350_p6, %p344_p3 }
  0x10   :  { %354 = shalt.err (!%p351_p7)
}
  0x11   :  { %s428_s28 = smov 64   ;;  %s429_s29 = smov 4  }
  0x12   :  { %34 = dma.hbm_to_vmem [thread:$0]  %s526_s1, 256, %s29_s19, [#allocation6], %s428_s28, %s428_s28, %s429_s29  }
  0x13   :  { %s430_s7 = smov [#allocation2]   ;;  %s431_s9 = smov [#allocation7]  }
  0x14   :  { %s19_s8 = sshll.u32 %s430_s7, 4  ;;  %s42_s10 = sshll.u32 %s431_s9, 4  ;;  %s20_s8 = int_to_ptr.vmem [resolvable:$true] %s19_s8  ;;  %s43_s10 = int_to_ptr.vmem [resolvable:$true] %s42_s10 }
  0x15   :  { %s355_s13 = scalar_lea.hbm %s525_s0, 128 }
  0x16   :  { %p356_p8 = scmp.ne.s32.totalorder %s525_s0, %s355_s13  ;;  %p359_p9 = scmp.lt.u32.totalorder %s355_s13, %s525_s0 }
  0x18   :  { %p361_p10 = pnand %p359_p9, %p356_p8 }
  0x1a   :  { %364 = shalt.err (!%p361_p10)
}
  0x1b   :  { %s365_s1 = scalar_lea.vmem %s20_s8, 128  ;;  %p370_p12 = scmp.lt.s32.totalorder %s20_s8, %s20_s8 }
  0x1c   :  { %p366_p11 = scmp.ne.s32.totalorder %s20_s8, %s365_s1  ;;  %p371_p13 = scmp.lt.s32.totalorder %s365_s1, %s365_s1 }
  0x1e   :  { %p372_p0 = por %p371_p13, %p370_p12 }
  0x20   :  { %p373_p1 = pnand %p372_p0, %p366_p11 }
  0x22   :  { %376 = shalt.err (!%p373_p1)
}
  0x23   :  { %22 = dma.hbm_to_vmem [thread:$0]  %s525_s0, 128, %s20_s8, [#allocation3]  }
  0x24   :  { %s377_s22 = scalar_lea.hbm %s528_s3, 1024 }
  0x25   :  { %p378_p2 = scmp.ne.s32.totalorder %s528_s3, %s377_s22  ;;  %p381_p3 = scmp.lt.u32.totalorder %s377_s22, %s528_s3 }
  0x27   :  { %p383_p4 = pnand %p381_p3, %p378_p2 }
  0x29   :  { %386 = shalt.err (!%p383_p4)
}
  0x2a   :  { %s387_s27 = scalar_lea.vmem %s43_s10, 1024  ;;  %p392_p6 = scmp.lt.s32.totalorder %s43_s10, %s43_s10 }
  0x2b   :  { %p388_p5 = scmp.ne.s32.totalorder %s43_s10, %s387_s27  ;;  %p393_p7 = scmp.lt.s32.totalorder %s387_s27, %s387_s27 }
  0x2d   :  { %p394_p8 = por %p393_p7, %p392_p6 }
  0x2f   :  { %p395_p9 = pnand %p394_p8, %p388_p5 }
  0x31   :  { %398 = shalt.err (!%p395_p9)
}
  0x32   :  { %48 = dma.hbm_to_vmem [thread:$0]  %s528_s3, 1024, %s43_s10, [#allocation6], %s428_s28, %s428_s28, %s429_s29  }
  0x33   :  { %421 = dma.done.wait [#allocation3], 128  }
  0x34   :  { %422 = vsyncadd [#allocation3], 4294967168 }
  0x35   :  { %423 = dma.done.wait [#allocation6], 1280  }
  0x36   :  { %424 = vsyncadd [#allocation6], 4294966016  ;;  %v432_v0 = vmov 0.0   ;;  %vm433_vm0 = vmmov 0   ;;  %v323_v1 = vld [vmem:[#allocation5] sm:$0xff]   ;;  %v324_v2 = vld [vmem:[#allocation5 + $0x8] sm:$0xff]  }
  0x37   :  { %287 = vmatprep.subr.bf16.mxu0 %v432_v0  ;;  %291 = vmatprep.mubr.msk.bf16.mxu0 %vm433_vm0, %v432_v0  ;;  %v61_v3 = vld [vmem:[#allocation2] sm:$0xff]  ;;  %v325_v4 = vld [vmem:[#allocation7] sm:$0xff]   ;;  %vm86_vm1 = vcmask 261120   ;;  %v327_v7 = vld [vmem:[#allocation7 + $0x10] sm:$0xff]   ;;  %s434_s7 = smov [#allocation8]   ;;  %vm244_vm2 = vcmask 80896  }
  0x38   :  { %295 = vmatprep.subr.bf16.mxu1 %v432_v0  ;;  %311 = vmatprep.mubr.msk.bf16.mxu1 %vm433_vm0, %v432_v0  ;;  %v62_v5 = vpack.c.bf16 %v61_v3, %v61_v3  ;;  %v326_v6 = vld [vmem:[#allocation7 + $0x8] sm:$0xff]   ;;  %v328_v8 = vld [vmem:[#allocation7 + $0x18] sm:$0xff]   ;;  %v329_v9 = vld [vmem:[#allocation7 + $0x20] sm:$0xff]   ;;  %s252_s8 = sshll.u32 %s434_s7, 4  ;;  %s253_s8 = int_to_ptr.vmem [resolvable:$true] %s252_s8 }
  0x39   :  { %288 = vmatpush3.bf16.msra.mxu0 %v323_v1  ;;  %296 = vmatpush3.bf16.msra.mxu1 %v325_v4  ;;  %v330_v10 = vld [vmem:[#allocation7 + $0x28] sm:$0xff]   ;;  %v331_v11 = vld [vmem:[#allocation7 + $0x30] sm:$0xff]   ;;  %v332_v12 = vld [vmem:[#allocation7 + $0x38] sm:$0xff]   ;;  %p404_p11 = scmp.lt.s32.totalorder %s253_s8, %s253_s8 }
  0x3a   :  { %289 = vmatprep.subr.bf16.mxu0 %v432_v0  ;;  %297 = vmatprep.subr.bf16.mxu1 %v432_v0  ;;  %v262_v13 = vld [vmem:[%s527_s2] ss:$0 sm:$0xff]  ;;  %s399_s2 = scalar_lea.vmem %s253_s8, 128 }
  0x3b   :  { %v274_v21 = vld [vmem:[%s529_s4] ss:$0 sm:$0xff]  ;;  %p400_p10 = scmp.ne.s32.totalorder %s253_s8, %s399_s2  ;;  %p405_p12 = scmp.lt.s32.totalorder %s399_s2, %s399_s2 }
  0x3d   :  { %290 = vmatpush3.bf16.msra.mxu0 %v324_v2  ;;  %298 = vmatpush3.bf16.msra.mxu1 %v326_v6  ;;  %p406_p13 = por %p405_p12, %p404_p11 }
  0x3e   :  { %299 = vmatprep.subr.bf16.mxu1 %v432_v0 }
  0x3f   :  { %p407_p0 = pnand %p406_p13, %p400_p10 }
  0x40   :  { %292 = vmatmul.mubr.msk.bf16.vlgmr.msra.gmra.mrb[0].mxu0 %vm86_vm1, %v62_v5 }
  0x41   :  { %300 = vmatpush3.bf16.msra.mxu1 %v327_v7 }
  0x42   :  { %301 = vmatprep.subr.bf16.mxu1 %v432_v0 }
  0x45   :  { %302 = vmatpush3.bf16.msra.mxu1 %v328_v8 }
  0x46   :  { %303 = vmatprep.subr.bf16.mxu1 %v432_v0 }
  0x49   :  { %304 = vmatpush3.bf16.msra.mxu1 %v329_v9 }
  0x4a   :  { %305 = vmatprep.subr.bf16.mxu1 %v432_v0 }
  0x4d   :  { %306 = vmatpush3.bf16.msra.mxu1 %v330_v10 }
  0x4e   :  { %307 = vmatprep.subr.bf16.mxu1 %v432_v0 }
  0x51   :  { %308 = vmatpush3.bf16.msra.mxu1 %v331_v11 }
  0x52   :  { %309 = vmatprep.subr.bf16.mxu1 %v432_v0 }
  0x55   :  { %310 = vmatpush3.bf16.msra.mxu1 %v332_v12 }
 0x113   :  { %v124_v14 = vpop.f32.mrb[0].mxu0 }
 0x114   :  { %v125_v15 = vadd.f32 %v262_v13, %v124_v14  ;;  %v293_v16 = vpop.f32.mrb[1].mxu0 }
 0x115   :  { %v127_v17 = vpop.f32.mrb[2].mxu0 }
 0x116   :  { %v130_v18 = vmax.f32 %v125_v15, 0.0  ;;  %v294_v19 = vpop.f32.mrb[3].mxu0 }
 0x118   :  { %v131_v20 = vpack.c.bf16 %v130_v18, %v130_v18 }
 0x11a   :  { %312 = vmatmul.mubr.bf16.vlgmr.msra.gmra.mrb[0].mxu1 %v131_v20 }
 0x1ed   :  { %v230_v22 = vpop.f32.mrb[0].mxu1 }
 0x1ee   :  { %v243_v23 = vadd.f32 %v274_v21, %v230_v22  ;;  %v313_v24 = vpop.f32.mrb[1].mxu1 }
 0x1ef   :  { %v233_v25 = vpop.f32.mrb[2].mxu1 }
 0x1f0   :  { %v314_v26 = vpop.f32.mrb[3].mxu1  ;;  %245 = vst.msk [vmem:[#allocation8] sm:$0xff] %vm244_vm2, %v243_v23 }
 0x1f1   :  { %410 = shalt.err (!%p407_p0)
}
 0x1f2   :  { %s411_s4 = scalar_lea.hbm %s530_s5, 128 }
 0x1f3   :  { %p412_p1 = scmp.ne.s32.totalorder %s530_s5, %s411_s4  ;;  %p415_p2 = scmp.lt.u32.totalorder %s411_s4, %s530_s5 }
 0x1f5   :  { %p417_p3 = pnand %p415_p2, %p412_p1 }
 0x1f7   :  { %420 = shalt.err (!%p417_p3)
}
 0x1f8   :  { %255 = dma.vmem_to_hbm [thread:$0]  %s253_s8, 128, %s530_s5, [#allocation4]  }
 0x1f9   :  { %425 = dma.done.wait [#allocation4], 128  }
 0x1fa   :  { %426 = vsyncadd [#allocation4], 4294967168 }
 0x1fb   :  { %259 = vsyncpa [#allocation3], 1 }
 0x1fc   :  { %260 = vsyncpa [#allocation6], 1 }
 0x1fd   :  { %261 = vsyncpa [#allocation4], 1 }

</bundles_post_ra>
